<compile_context>
chip_gen: v7x
topology: tpu7x:2x2x1
jax: 0.10.0
libtpu: 0.0.40
codegen_flags: <defaults>
</compile_context>

<pallas_src>
import functools

import jax
import jax.numpy as jnp
from jax.experimental import pallas as pl
from jax.experimental.pallas import tpu as pltpu


def _round_up(x, m):
    return ((x + m - 1) // m) * m


# ----------------------------------------------------------------------------
# Pallas kernel: fused  (1x1 conv + BN + ReLU) x 2  +  max-pool over k
# ----------------------------------------------------------------------------
def td_mlp_kernel(x_ref, w1_ref, b1_ref, w2_ref, b2_ref, feat_ref, pooled_ref, *, k):
    # x_ref: (k, tile_s, cin_p) bf16, neighbor index j is the leading axis.
    ts, cout_p = pooled_ref.shape
    cin_p = x_ref.shape[-1]

    # Leading-dim merge (k, ts, cin_p) -> (k*ts, cin_p): contiguous, no data movement.
    x = x_ref[...].reshape(k * ts, cin_p)

    # Layer 1: bf16 MXU matmul, f32 accumulate, bias+ReLU in f32.
    h1 = jnp.dot(x, w1_ref[...], preferred_element_type=jnp.float32)
    h1 = jnp.maximum(h1 + b1_ref[...], 0.0)

    # Layer 2: cast activations back to bf16 for the MXU.
    h2 = jnp.dot(h1.astype(w2_ref.dtype), w2_ref[...],
                 preferred_element_type=jnp.float32)
    h2 = jnp.maximum(h2 + b2_ref[...], 0.0)

    h2_3d = h2.reshape(k, ts, cout_p)
    feat_ref[...] = h2_3d.astype(feat_ref.dtype)

    # Max over the k neighbors: k-1 elementwise maximums over (ts, cout_p)
    # slabs (VPU only; no cross-sublane reduce, no tile-crossing reshape).
    pooled = h2_3d[0]
    for j in range(1, k):
        pooled = jnp.maximum(pooled, h2_3d[j])
    pooled_ref[...] = pooled.astype(pooled_ref.dtype)


def _choose_tile_s(R, k, cin_p, chid_p, cout_p, budget_bytes=20 * 1024 * 1024):
    """Row tile (in sampled points) sized against a VMEM budget that is safe on
    v5e/v6e (128 MiB physical) and v7x (64 MiB physical)."""
    def vmem_bytes(ts):
        rows = k * ts
        x_blk = 2 * rows * cin_p * 2            # bf16 input, double-buffered
        feat_blk = 2 * rows * cout_p * 4        # f32 output, double-buffered
        pooled_blk = 2 * ts * cout_p * 4        # f32 output, double-buffered
        inter = rows * (chid_p + cout_p) * 4    # f32 h1/h2 temporaries
        wts = 2 * ((cin_p * chid_p + chid_p * cout_p) * 2 + (chid_p + cout_p) * 4)
        return x_blk + feat_blk + pooled_blk + inter + wts

    ts = 512
    while ts > 16 and (vmem_bytes(ts) > budget_bytes or k * ts > 4096):
        ts //= 2
    # Keep a few grid steps so DMA pipelines and both v7x TCs get work.
    while ts > 64 and (R + ts - 1) // ts < 4:
        ts //= 2
    ts = max(16, ts)
    ts = min(ts, _round_up(R, 16))   # don't over-pad tiny problems
    return ts


def td_mlp_pallas(x, w1t, b1, w2t, b2, *, k, tile_s):
    """x: [k, R_pad, cin_p] bf16 -> (feat [k, R_pad, cout_p], pooled [R_pad, cout_p])."""
    kk, R_pad, cin_p = x.shape
    assert kk == k and R_pad % tile_s == 0
    chid_p = w1t.shape[1]
    cout_p = w2t.shape[1]
    grid = (R_pad // tile_s,)

    feat, pooled = pl.pallas_call(
        functools.partial(td_mlp_kernel, k=k),
        out_shape=(
            jax.ShapeDtypeStruct((k, R_pad, cout_p), jnp.float32),
            jax.ShapeDtypeStruct((R_pad, cout_p), jnp.float32),
        ),
        grid_spec=pltpu.PrefetchScalarGridSpec(
            num_scalar_prefetch=0,
            grid=grid,
            in_specs=[
                pl.BlockSpec((k, tile_s, cin_p), lambda i: (0, i, 0)),
                pl.BlockSpec((cin_p, chid_p), lambda i: (0, 0)),   # resident weights
                pl.BlockSpec((1, chid_p), lambda i: (0, 0)),
                pl.BlockSpec((chid_p, cout_p), lambda i: (0, 0)),
                pl.BlockSpec((1, cout_p), lambda i: (0, 0)),
            ],
            out_specs=[
                pl.BlockSpec((k, tile_s, cout_p), lambda i: (0, i, 0)),
                pl.BlockSpec((tile_s, cout_p), lambda i: (i, 0)),
            ],
        ),
        compiler_params=pltpu.CompilerParams(
            dimension_semantics=("parallel",),
            vmem_limit_bytes=64 * 1024 * 1024),
    )(x, w1t, b1, w2t, b2)
    return feat, pooled


# ----------------------------------------------------------------------------
# Plain-JAX glue: FPS, kNN, grouping  (data-dependent indexing)
# ----------------------------------------------------------------------------
def farthest_point_sample(xyz, npoint):
    """xyz: [B, N, 3] -> idx [B, npoint] (deterministic start at index 0)."""
    B, N, _ = xyz.shape

    def body(i, state):
        dists, farthest, idxs = state
        idxs = idxs.at[:, i].set(farthest)
        centroid = jnp.take_along_axis(xyz, farthest[:, None, None], axis=1)  # [B,1,3]
        d = jnp.sum((xyz - centroid) ** 2, axis=-1)                           # [B,N]
        dists = jnp.minimum(dists, d)
        farthest = jnp.argmax(dists, axis=-1).astype(jnp.int32)
        return dists, farthest, idxs

    state = (jnp.full((B, N), 1e10, jnp.float32),
             jnp.zeros((B,), jnp.int32),
             jnp.zeros((B, npoint), jnp.int32))
    _, _, idxs = jax.lax.fori_loop(0, npoint, body, state)
    return idxs


def knn_idx(ref_pts, query_pts, k):
    """ref_pts: [B,N,3], query_pts: [B,S,3] -> idx [B,S,k] into ref_pts."""
    d2 = jnp.sum((query_pts[:, :, None, :] - ref_pts[:, None, :, :]) ** 2, axis=-1)
    _, idx = jax.lax.top_k(-d2, k)
    return idx.astype(jnp.int32)


# ----------------------------------------------------------------------------
# Parameter init (deterministic, synthetic) with BN folded (eval-mode stats),
# channel dims zero-padded to multiples of 128, weights cast to bf16.
# ----------------------------------------------------------------------------
def init_params(input_dim, out_dim, key):
    # TODO(synk): PyTorch BatchNorm2d in training mode uses batch statistics;
    # here we fold eval-mode running stats (mean=0, var=1, gamma=1, beta=0).
    cin = input_dim + 3
    eps = 1e-5
    k1, k2, k3, k4 = jax.random.split(key, 4)
    w1 = 0.1 * jax.random.normal(k1, (input_dim, cin), jnp.float32)   # Conv2d(cin->input_dim,1)
    b1 = 0.1 * jax.random.normal(k2, (input_dim,), jnp.float32)
    w2 = 0.1 * jax.random.normal(k3, (out_dim, input_dim), jnp.float32)  # Conv2d(input_dim->out_dim,1)
    b2 = 0.1 * jax.random.normal(k4, (out_dim,), jnp.float32)

    s1 = 1.0 / jnp.sqrt(1.0 + eps)
    s2 = 1.0 / jnp.sqrt(1.0 + eps)
    w1f = (w1 * s1).T                    # [cin, input_dim]
    b1f = b1 * s1
    w2f = (w2 * s2).T                    # [input_dim, out_dim]
    b2f = b2 * s2

    cin_p = _round_up(cin, 128)
    chid_p = _round_up(input_dim, 128)
    cout_p = _round_up(out_dim, 128)

    w1t = jnp.zeros((cin_p, chid_p), jnp.float32).at[:cin, :input_dim].set(w1f)
    w2t = jnp.zeros((chid_p, cout_p), jnp.float32).at[:input_dim, :out_dim].set(w2f)
    b1p = jnp.zeros((1, chid_p), jnp.float32).at[0, :input_dim].set(b1f)
    b2p = jnp.zeros((1, cout_p), jnp.float32).at[0, :out_dim].set(b2f)

    return {
        "w1t": w1t.astype(jnp.bfloat16),   # [cin_p, chid_p]
        "b1": b1p,                         # [1, chid_p] f32
        "w2t": w2t.astype(jnp.bfloat16),   # [chid_p, cout_p]
        "b2": b2p,                         # [1, cout_p] f32
        "input_dim": input_dim,
        "out_dim": out_dim,
    }


# ----------------------------------------------------------------------------
# TDLayer forward
# ----------------------------------------------------------------------------
def td_layer_forward(xyz, points, params, *, npoint, k):
    """
    xyz:    [B, 3, N]
    points: [B, C, N]
    returns (new_xyz [B,3,npoint], pooled [B,out,npoint],
             grouped_xyz_norm [B,3,npoint,k], new_points [B,out,npoint,k])
    """
    B, _, N = xyz.shape
    C = points.shape[1]
    k = min(npoint, k)
    out_dim = params["out_dim"]

    xyz_t = jnp.transpose(xyz, (0, 2, 1))          # [B, N, 3]
    points_t = jnp.transpose(points, (0, 2, 1))    # [B, N, C] channels-last for the gather

    if npoint < N:
        fps_idx = farthest_point_sample(xyz_t, npoint)
        new_xyz = jax.vmap(lambda p, i: p[i])(xyz_t, fps_idx)  # [B, npoint, 3]
    else:
        new_xyz = xyz_t

    idx = knn_idx(xyz_t, new_xyz, k)                # [B, npoint, k]
    idx_t = jnp.transpose(idx, (2, 0, 1))           # [k, B, npoint] (small int transpose)

    gather_b = jax.vmap(lambda p, i: p[i])          # ([N,C],[S]) -> [S,C], over batch
    grouped_xyz = jax.vmap(lambda ix: gather_b(xyz_t, ix))(idx_t)      # [k,B,S,3]
    grouped_pts = jax.vmap(lambda ix: gather_b(points_t, ix))(idx_t)   # [k,B,S,C]
    gxyz_norm_kbs = grouped_xyz - new_xyz[None]                        # [k,B,S,3]

    cin = C + 3
    cin_p = params["w1t"].shape[0]
    chid_p = params["w1t"].shape[1]
    cout_p = params["w2t"].shape[1]

    # j-major, channels-last slab for the kernel: [k, R, cin] -> pad rows/lanes.
    x = jnp.concatenate([gxyz_norm_kbs, grouped_pts], axis=-1)         # [k,B,S,cin]
    R = B * npoint
    x = x.reshape(k, R, cin).astype(jnp.bfloat16)

    tile_s = _choose_tile_s(R, k, cin_p, chid_p, cout_p)
    R_pad = _round_up(R, tile_s)
    x = jnp.pad(x, ((0, 0), (0, R_pad - R), (0, cin_p - cin)))

    feat3d, pooled2d = td_mlp_pallas(x, params["w1t"], params["b1"],
                                     params["w2t"], params["b2"],
                                     k=k, tile_s=tile_s)

    # Back to the PyTorch NCHW-style output layout (required by the module API).
    feat = feat3d[:, :R, :out_dim].reshape(k, B, npoint, out_dim)
    feat = jnp.transpose(feat, (1, 3, 2, 0))                            # [B,out,npoint,k]
    pooled = pooled2d[:R, :out_dim].reshape(B, npoint, out_dim)
    pooled = jnp.transpose(pooled, (0, 2, 1))                           # [B,out,npoint]
    gnorm = jnp.transpose(gxyz_norm_kbs, (1, 3, 2, 0))                  # [B,3,npoint,k]
    new_xyz_out = jnp.transpose(new_xyz, (0, 2, 1))                     # [B,3,npoint]
    return new_xyz_out, pooled, gnorm, feat


# ----------------------------------------------------------------------------
if __name__ == "__main__":
    B, C, N = 2, 4, 16          # batch, input feature dim, number of points
    npoint, k, out_dim = 8, 4, 8

    key = jax.random.PRNGKey(0)
    kx, kp, kw = jax.random.split(key, 3)
    xyz = jax.random.normal(kx, (B, 3, N), jnp.float32)
    points = jax.random.normal(kp, (B, C, N), jnp.float32)
    params = init_params(C, out_dim, kw)

    outs = td_layer_forward(xyz, points, params, npoint=npoint, k=k)
    outs = jax.block_until_ready(outs)

    new_xyz, pooled, gnorm, feat = outs
    k_eff = min(npoint, k)
    assert new_xyz.shape == (B, 3, npoint)
    assert pooled.shape == (B, out_dim, npoint)
    assert gnorm.shape == (B, 3, npoint, k_eff)
    assert feat.shape == (B, out_dim, npoint, k_eff)
    assert bool(jnp.all(jnp.isfinite(pooled)))
    assert bool(jnp.all(jnp.isfinite(feat)))
    # pooled must equal the max over the k axis of feat (same kernel pass)
    assert bool(jnp.allclose(pooled, jnp.max(feat, axis=3), atol=1e-5))

    print("KERNEL_OK")
</pallas_src>

<mosaic_0001>
module attributes {stable_mosaic.version = 11 : i64} {
  func.func @td_mlp_kernel(%arg0: i32, %arg1: memref<4x16x128xbf16, #tpu.memory_space<vmem>>, %arg2: memref<128x128xbf16, #tpu.memory_space<vmem>>, %arg3: memref<1x128xf32, #tpu.memory_space<vmem>>, %arg4: memref<128x128xbf16, #tpu.memory_space<vmem>>, %arg5: memref<1x128xf32, #tpu.memory_space<vmem>>, %arg6: memref<4x16x128xf32, #tpu.memory_space<vmem>>, %arg7: memref<16x128xf32, #tpu.memory_space<vmem>>) attributes {dimension_semantics = [#tpu.dimension_semantics<parallel>], iteration_bounds = array<i64: 1>, scalar_prefetch = 0 : i64, scratch_operands = 0 : i64, tpu.core_type = #tpu.core_type<tc>, window_params = [{transform_indices = @transform_0, window_bounds = array<i64: 4, 16, 128>}, {pipeline_mode = #tpu.pipeline_mode<synchronous>, transform_indices = @transform_1, window_bounds = array<i64: 128, 128>}, {pipeline_mode = #tpu.pipeline_mode<synchronous>, transform_indices = @transform_2, window_bounds = array<i64: 1, 128>}, {pipeline_mode = #tpu.pipeline_mode<synchronous>, transform_indices = @transform_3, window_bounds = array<i64: 128, 128>}, {pipeline_mode = #tpu.pipeline_mode<synchronous>, transform_indices = @transform_4, window_bounds = array<i64: 1, 128>}, {transform_indices = @transform_5, window_bounds = array<i64: 4, 16, 128>}, {transform_indices = @transform_6, window_bounds = array<i64: 16, 128>}]} {
    %c0 = arith.constant 0 : index
    %c0_0 = arith.constant 0 : index
    %c0_1 = arith.constant 0 : index
    %0 = vector.load %arg1[%c0, %c0_0, %c0_1] : memref<4x16x128xbf16, #tpu.memory_space<vmem>>, vector<4x16x128xbf16>
    %1 = vector.shape_cast %0 : vector<4x16x128xbf16> to vector<64x128xbf16>
    %c0_2 = arith.constant 0 : index
    %c0_3 = arith.constant 0 : index
    %2 = vector.load %arg2[%c0_2, %c0_3] : memref<128x128xbf16, #tpu.memory_space<vmem>>, vector<128x128xbf16>
    %cst = arith.constant dense<0.000000e+00> : vector<64x128xf32>
    %3 = tpu.matmul %1, %2, %cst {dimension_numbers = #tpu.dot_dimension_numbers<[1], [0], [0], [1], [0, 0, 1, 1], [], []>} : vector<64x128xbf16>, vector<128x128xbf16>, vector<64x128xf32> -> vector<64x128xf32>
    %c0_4 = arith.constant 0 : index
    %c0_5 = arith.constant 0 : index
    %4 = vector.load %arg3[%c0_4, %c0_5] : memref<1x128xf32, #tpu.memory_space<vmem>>, vector<1x128xf32>
    %5 = vector.broadcast %4 : vector<1x128xf32> to vector<64x128xf32>
    %6 = arith.addf %3, %5 : vector<64x128xf32>
    %cst_6 = arith.constant 0.000000e+00 : f32
    %7 = vector.broadcast %cst_6 : f32 to vector<64x128xf32>
    %8 = arith.maximumf %6, %7 : vector<64x128xf32>
    %9 = arith.truncf %8 : vector<64x128xf32> to vector<64x128xbf16>
    %c0_7 = arith.constant 0 : index
    %c0_8 = arith.constant 0 : index
    %10 = vector.load %arg4[%c0_7, %c0_8] : memref<128x128xbf16, #tpu.memory_space<vmem>>, vector<128x128xbf16>
    %cst_9 = arith.constant dense<0.000000e+00> : vector<64x128xf32>
    %11 = tpu.matmul %9, %10, %cst_9 {dimension_numbers = #tpu.dot_dimension_numbers<[1], [0], [0], [1], [0, 0, 1, 1], [], []>} : vector<64x128xbf16>, vector<128x128xbf16>, vector<64x128xf32> -> vector<64x128xf32>
    %c0_10 = arith.constant 0 : index
    %c0_11 = arith.constant 0 : index
    %12 = vector.load %arg5[%c0_10, %c0_11] : memref<1x128xf32, #tpu.memory_space<vmem>>, vector<1x128xf32>
    %13 = vector.broadcast %12 : vector<1x128xf32> to vector<64x128xf32>
    %14 = arith.addf %11, %13 : vector<64x128xf32>
    %cst_12 = arith.constant 0.000000e+00 : f32
    %15 = vector.broadcast %cst_12 : f32 to vector<64x128xf32>
    %16 = arith.maximumf %14, %15 : vector<64x128xf32>
    %17 = vector.shape_cast %16 : vector<64x128xf32> to vector<4x16x128xf32>
    %c0_13 = arith.constant 0 : index
    %c0_14 = arith.constant 0 : index
    %c0_15 = arith.constant 0 : index
    %18 = vector.load %arg6[%c0_13, %c0_14, %c0_15] : memref<4x16x128xf32, #tpu.memory_space<vmem>>, vector<4x16x128xf32>
    tpu.vector_store %arg6[%c0_13, %c0_14, %c0_15], %17 {strides = array<i32>} : memref<4x16x128xf32, #tpu.memory_space<vmem>>, vector<4x16x128xf32>,
    %19 = vector.extract_strided_slice %17 {offsets = [0, 0, 0], sizes = [1, 16, 128], strides = [1, 1, 1]} : vector<4x16x128xf32> to vector<1x16x128xf32>
    %20 = vector.shape_cast %19 : vector<1x16x128xf32> to vector<16x128xf32>
    %21 = vector.extract_strided_slice %17 {offsets = [1, 0, 0], sizes = [1, 16, 128], strides = [1, 1, 1]} : vector<4x16x128xf32> to vector<1x16x128xf32>
    %22 = vector.shape_cast %21 : vector<1x16x128xf32> to vector<16x128xf32>
    %23 = arith.maximumf %20, %22 : vector<16x128xf32>
    %24 = vector.extract_strided_slice %17 {offsets = [2, 0, 0], sizes = [1, 16, 128], strides = [1, 1, 1]} : vector<4x16x128xf32> to vector<1x16x128xf32>
    %25 = vector.shape_cast %24 : vector<1x16x128xf32> to vector<16x128xf32>
    %26 = arith.maximumf %23, %25 : vector<16x128xf32>
    %27 = vector.extract_strided_slice %17 {offsets = [3, 0, 0], sizes = [1, 16, 128], strides = [1, 1, 1]} : vector<4x16x128xf32> to vector<1x16x128xf32>
    %28 = vector.shape_cast %27 : vector<1x16x128xf32> to vector<16x128xf32>
    %29 = arith.maximumf %26, %28 : vector<16x128xf32>
    %c0_16 = arith.constant 0 : index
    %c0_17 = arith.constant 0 : index
    %30 = vector.load %arg7[%c0_16, %c0_17] : memref<16x128xf32, #tpu.memory_space<vmem>>, vector<16x128xf32>
    tpu.vector_store %arg7[%c0_16, %c0_17], %29 {strides = array<i32>} : memref<16x128xf32, #tpu.memory_space<vmem>>, vector<16x128xf32>,
    return
  }
  func.func @transform_0(%arg0: i32) -> (i32, i32, i32) {
    %c0_i32 = arith.constant 0 : i32
    %c0_i32_0 = arith.constant 0 : i32
    %c0_i32_1 = arith.constant 0 : i32
    return %c0_i32, %arg0, %c0_i32_0 : i32, i32, i32
  }
  func.func @transform_1(%arg0: i32) -> (i32, i32) {
    %c0_i32 = arith.constant 0 : i32
    %c0_i32_0 = arith.constant 0 : i32
    %c0_i32_1 = arith.constant 0 : i32
    return %c0_i32, %c0_i32_0 : i32, i32
  }
  func.func @transform_2(%arg0: i32) -> (i32, i32) {
    %c0_i32 = arith.constant 0 : i32
    %c0_i32_0 = arith.constant 0 : i32
    %c0_i32_1 = arith.constant 0 : i32
    return %c0_i32, %c0_i32_0 : i32, i32
  }
  func.func @transform_3(%arg0: i32) -> (i32, i32) {
    %c0_i32 = arith.constant 0 : i32
    %c0_i32_0 = arith.constant 0 : i32
    %c0_i32_1 = arith.constant 0 : i32
    return %c0_i32, %c0_i32_0 : i32, i32
  }
  func.func @transform_4(%arg0: i32) -> (i32, i32) {
    %c0_i32 = arith.constant 0 : i32
    %c0_i32_0 = arith.constant 0 : i32
    %c0_i32_1 = arith.constant 0 : i32
    return %c0_i32, %c0_i32_0 : i32, i32
  }
  func.func @transform_5(%arg0: i32) -> (i32, i32, i32) {
    %c0_i32 = arith.constant 0 : i32
    %c0_i32_0 = arith.constant 0 : i32
    %c0_i32_1 = arith.constant 0 : i32
    return %c0_i32, %arg0, %c0_i32_0 : i32, i32, i32
  }
  func.func @transform_6(%arg0: i32) -> (i32, i32) {
    %c0_i32 = arith.constant 0 : i32
    %c0_i32_0 = arith.constant 0 : i32
    return %arg0, %c0_i32 : i32, i32
  }
}

</mosaic_0001>

<bundles_post_ra>
// kernel: tpu_custom_call.1
= control target key start
LH: loop header
LB: loop body
LE: loop exit
PB: predicated region body
PF: predicated region fallthrough
CT: control target
= control target key end

     0   :  { %12 = vsyncpa [#allocation3], 0  ;;  %s899_s0 = inlined_call_operand.hbm [shape: bf16[4,16,128], index: 0, kind: input, shape index: {}]   ;;  %s900_s1 = inlined_call_operand.hbm [shape: bf16[128,128], index: 1, kind: input, shape index: {}]   ;;  %s901_s2 = inlined_call_operand.hbm [shape: f32[1,128], index: 2, kind: input, shape index: {}]   ;;  %s902_s3 = inlined_call_operand.hbm [shape: bf16[128,128], index: 3, kind: input, shape index: {}]   ;;  %s903_s4 = inlined_call_operand.hbm [shape: f32[1,128], index: 4, kind: input, shape index: {}]   ;;  %s904_s5 = inlined_call_operand.hbm [shape: f32[4,16,128], index: 5, kind: output, shape index: {0}]   ;;  %s905_s6 = inlined_call_operand.hbm [shape: f32[16,128], index: 6, kind: output, shape index: {1}]  }
   0x1   :  { %13 = vsyncpa [#allocation6], 0 }
   0x2   :  { %14 = vsyncpa [#allocation9], 0 }
   0x3   :  { %15 = vsyncpa [#allocation4], 0 }
   0x4   :  { %16 = vsyncpa [#allocation13], 0  ;;  %s753_s21 = smov [#allocation5]   ;;  %s754_s23 = smov [#allocation8]  }
   0x5   :  { %s34_s22 = sshll.u32 %s753_s21, 4  ;;  %s56_s24 = sshll.u32 %s754_s23, 4  ;;  %s35_s22 = int_to_ptr.vmem [resolvable:$true] %s34_s22  ;;  %s799_s24 = int_to_ptr.vmem [resolvable:$true] %s56_s24 }
   0x6   :  { %s589_s27 = scalar_lea.hbm %s900_s1, 1024 }
   0x7   :  { %p590_p0 = scmp.ne.s32.totalorder %s900_s1, %s589_s27  ;;  %p593_p1 = scmp.lt.u32.totalorder %s589_s27, %s900_s1 }
   0x9   :  { %p595_p2 = pnand %p593_p1, %p590_p0 }
   0xb   :  { %598 = shalt.err (!%p595_p2)
}
   0xc   :  { %s599_s8 = scalar_lea.vmem %s35_s22, 1024  ;;  %p604_p4 = scmp.lt.s32.totalorder %s35_s22, %s35_s22 }
   0xd   :  { %p600_p3 = scmp.ne.s32.totalorder %s35_s22, %s599_s8  ;;  %p605_p5 = scmp.lt.s32.totalorder %s599_s8, %s599_s8 }
   0xf   :  { %p606_p6 = por %p605_p5, %p604_p4 }
  0x11   :  { %p607_p7 = pnand %p606_p6, %p600_p3 }
  0x13   :  { %610 = shalt.err (!%p607_p7)
}
  0x14   :  { %s755_s9 = smov 64   ;;  %s756_s10 = smov 4  }
  0x15   :  { %40 = dma.hbm_to_vmem [thread:$0]  %s900_s1, 1024, %s35_s22, [#allocation6], %s755_s9, %s755_s9, %s756_s10  }
  0x16   :  { %s611_s15 = scalar_lea.hbm %s902_s3, 1024 }
  0x17   :  { %p612_p8 = scmp.ne.s32.totalorder %s902_s3, %s611_s15  ;;  %p615_p9 = scmp.lt.u32.totalorder %s611_s15, %s902_s3 }
  0x19   :  { %p617_p10 = pnand %p615_p9, %p612_p8 }
  0x1b   :  { %620 = shalt.err (!%p617_p10)
}
  0x1c   :  { %s621_s20 = scalar_lea.vmem %s799_s24, 1024  ;;  %p626_p12 = scmp.lt.s32.totalorder %s799_s24, %s799_s24 }
  0x1d   :  { %p622_p11 = scmp.ne.s32.totalorder %s799_s24, %s621_s20  ;;  %p627_p13 = scmp.lt.s32.totalorder %s621_s20, %s621_s20 }
  0x1f   :  { %p628_p0 = por %p627_p13, %p626_p12 }
  0x21   :  { %p629_p1 = pnand %p628_p0, %p622_p11 }
  0x23   :  { %632 = shalt.err (!%p629_p1)
}
  0x24   :  { %62 = dma.hbm_to_vmem [thread:$0]  %s902_s3, 1024, %s799_s24, [#allocation9], %s755_s9, %s755_s9, %s756_s10  }
  0x25   :  { %s757_s22 = smov [#allocation2]   ;;  %s758_s25 = smov [#allocation7]  }
  0x26   :  { %s22_s23 = sshll.u32 %s757_s22, 4  ;;  %s47_s26 = sshll.u32 %s758_s25, 4  ;;  %s23_s23 = int_to_ptr.vmem [resolvable:$true] %s22_s23  ;;  %s48_s26 = int_to_ptr.vmem [resolvable:$true] %s47_s26 }
  0x27   :  { %s633_s29 = scalar_lea.hbm %s899_s0, 512 }
  0x28   :  { %p634_p2 = scmp.ne.s32.totalorder %s899_s0, %s633_s29  ;;  %p637_p3 = scmp.lt.u32.totalorder %s633_s29, %s899_s0 }
  0x2a   :  { %p639_p4 = pnand %p637_p3, %p634_p2 }
  0x2c   :  { %642 = shalt.err (!%p639_p4)
}
  0x2d   :  { %s643_s3 = scalar_lea.vmem %s23_s23, 512  ;;  %p648_p6 = scmp.lt.s32.totalorder %s23_s23, %s23_s23 }
  0x2e   :  { %p644_p5 = scmp.ne.s32.totalorder %s23_s23, %s643_s3  ;;  %p649_p7 = scmp.lt.s32.totalorder %s643_s3, %s643_s3 }
  0x30   :  { %p650_p8 = por %p649_p7, %p648_p6 }
  0x32   :  { %p651_p9 = pnand %p650_p8, %p644_p5 }
  0x34   :  { %654 = shalt.err (!%p651_p9)
}
  0x35   :  { %28 = dma.hbm_to_vmem [thread:$0]  %s899_s0, 512, %s23_s23, [#allocation3], %s755_s9, %s755_s9, %s756_s10  }
  0x36   :  { %s655_s15 = scalar_lea.hbm %s901_s2, 16 }
  0x37   :  { %p656_p10 = scmp.ne.s32.totalorder %s901_s2, %s655_s15  ;;  %p659_p11 = scmp.lt.u32.totalorder %s655_s15, %s901_s2 }
  0x39   :  { %p661_p12 = pnand %p659_p11, %p656_p10 }
  0x3b   :  { %664 = shalt.err (!%p661_p12)
}
  0x3c   :  { %s665_s20 = scalar_lea.vmem %s48_s26, 16  ;;  %s669_s1 = scalar_lea.vmem %s48_s26, 32 }
  0x3d   :  { %p666_p13 = scmp.ne.s32.totalorder %s48_s26, %s665_s20  ;;  %p670_p0 = scmp.lt.s32.totalorder %s48_s26, %s48_s26 }
  0x3e   :  { %p671_p1 = scmp.lt.s32.totalorder %s669_s1, %s665_s20 }
  0x40   :  { %p672_p2 = por %p671_p1, %p670_p0 }
  0x42   :  { %p673_p3 = pnand %p672_p2, %p666_p13 }
  0x44   :  { %676 = shalt.err (!%p673_p3)
}
  0x45   :  { %50 = dma.hbm_to_vmem [thread:$0]  %s901_s2, 16, %s48_s26, [#allocation6]  }
  0x46   :  { %s759_s10 = smov [#allocation10]   ;;  %s677_s25 = scalar_lea.hbm %s903_s4, 16 }
  0x47   :  { %s69_s21 = sshll.u32 %s759_s10, 4  ;;  %p678_p4 = scmp.ne.s32.totalorder %s903_s4, %s677_s25  ;;  %s70_s21 = int_to_ptr.vmem [resolvable:$true] %s69_s21 }
  0x48   :  { %p681_p5 = scmp.lt.u32.totalorder %s677_s25, %s903_s4 }
  0x4a   :  { %p683_p6 = pnand %p681_p5, %p678_p4 }
  0x4c   :  { %686 = shalt.err (!%p683_p6)
}
  0x4d   :  { %s687_s7 = scalar_lea.vmem %s70_s21, 16  ;;  %s691_s2 = scalar_lea.vmem %s70_s21, 32 }
  0x4e   :  { %p688_p7 = scmp.ne.s32.totalorder %s70_s21, %s687_s7  ;;  %p692_p8 = scmp.lt.s32.totalorder %s70_s21, %s70_s21 }
  0x4f   :  { %p693_p9 = scmp.lt.s32.totalorder %s691_s2, %s687_s7 }
  0x51   :  { %p694_p10 = por %p693_p9, %p692_p8 }
  0x53   :  { %p695_p11 = pnand %p694_p10, %p688_p7 }
  0x55   :  { %698 = shalt.err (!%p695_p11)
}
  0x56   :  { %72 = dma.hbm_to_vmem [thread:$0]  %s903_s4, 16, %s70_s21, [#allocation9]  }
  0x57   :  { %743 = dma.done.wait [#allocation3], 512  }
  0x58   :  { %744 = vsyncadd [#allocation3], 4294966784 }
  0x59   :  { %745 = dma.done.wait [#allocation6], 1040  }
  0x5a   :  { %746 = vsyncadd [#allocation6], 4294966256 }
  0x5b   :  { %747 = dma.done.wait [#allocation9], 1040  }
  0x5c   :  { %748 = vsyncadd [#allocation9], 4294966256  ;;  %v569_v0 = vld [vmem:[#allocation5] sm:$0xff]   ;;  %v570_v1 = vld [vmem:[#allocation5 + $0x8] sm:$0xff]   ;;  %s760_s4 = smov [#allocation11]   ;;  %s761_s3 = smov [#allocation12]  }
  0x5d   :  { %510 = vmatprep.subr.bf16.mxu0 %v569_v0  ;;  %v571_v2 = vld [vmem:[#allocation5 + $0x10] sm:$0xff]   ;;  %v572_v3 = vld [vmem:[#allocation5 + $0x18] sm:$0xff]   ;;  %v577_v4 = vld [vmem:[#allocation2] sm:$0xff]   ;;  %s434_s11 = sshll.u32 %s760_s4, 4  ;;  %s446_s24 = sshll.u32 %s761_s3, 4  ;;  %s435_s11 = int_to_ptr.vmem [resolvable:$true] %s434_s11  ;;  %s447_s24 = int_to_ptr.vmem [resolvable:$true] %s446_s24 }
  0x5e   :  { %511 = vmatpush3.bf16.msra.mxu0 %v569_v0  ;;  %526 = vmatprep.mubr.bf16.mxu0 %v577_v4  ;;  %v573_v5 = vld [vmem:[#allocation5 + $0x20] sm:$0xff]   ;;  %v582_v7 = vld [vmem:[#allocation8 + $0x8] sm:$0xff]   ;;  %v583_v9 = vld [vmem:[#allocation8 + $0x10] sm:$0xff]   ;;  %s699_s12 = scalar_lea.vmem %s435_s11, 1024  ;;  %p704_p13 = scmp.lt.s32.totalorder %s435_s11, %s435_s11 }
  0x5f   :  { %512 = vmatprep.subr.bf16.mxu0 %v570_v1  ;;  %v581_v6 = vld [vmem:[#allocation8] sm:$0xff]   ;;  %v575_v10 = vld [vmem:[#allocation5 + $0x30] sm:$0xff]   ;;  %v584_v11 = vld [vmem:[#allocation8 + $0x18] sm:$0xff]   ;;  %p700_p12 = scmp.ne.s32.totalorder %s435_s11, %s699_s12  ;;  %p705_p0 = scmp.lt.s32.totalorder %s699_s12, %s699_s12 }
  0x60   :  { %534 = vmatprep.subr.bf16.mxu1 %v581_v6  ;;  %v574_v8 = vld [vmem:[#allocation5 + $0x28] sm:$0xff]   ;;  %v576_v12 = vld [vmem:[#allocation5 + $0x38] sm:$0xff]   ;;  %v579_v16 = vld [vmem:[#allocation2 + $0x10] sm:$0xff]  }
  0x61   :  { %535 = vmatpush3.bf16.msra.mxu1 %v581_v6  ;;  %v585_v13 = vld [vmem:[#allocation8 + $0x20] sm:$0xff]   ;;  %v586_v14 = vld [vmem:[#allocation8 + $0x28] sm:$0xff]   ;;  %v580_v17 = vld [vmem:[#allocation2 + $0x18] sm:$0xff]   ;;  %p706_p1 = por %p705_p0, %p704_p13 }
  0x62   :  { %513 = vmatpush3.bf16.msra.mxu0 %v570_v1  ;;  %536 = vmatprep.subr.bf16.mxu1 %v582_v7  ;;  %v578_v15 = vld [vmem:[#allocation2 + $0x8] sm:$0xff]   ;;  %v587_v18 = vld [vmem:[#allocation8 + $0x30] sm:$0xff]   ;;  %v588_v19 = vld [vmem:[#allocation8 + $0x38] sm:$0xff]  }
  0x63   :  { %514 = vmatprep.subr.bf16.mxu0 %v571_v2  ;;  %v464_v20 = vld [vmem:[#allocation7] ss:$0 sm:$0xff]  ;;  %v477_v49 = vld [vmem:[#allocation10] ss:$0 sm:$0xff]  ;;  %p707_p2 = pnand %p706_p1, %p700_p12 }
  0x65   :  { %537 = vmatpush3.bf16.msra.mxu1 %v582_v7 }
  0x66   :  { %515 = vmatpush3.bf16.msra.mxu0 %v571_v2  ;;  %538 = vmatprep.subr.bf16.mxu1 %v583_v9 }
  0x67   :  { %516 = vmatprep.subr.bf16.mxu0 %v572_v3 }
  0x69   :  { %539 = vmatpush3.bf16.msra.mxu1 %v583_v9 }
  0x6a   :  { %517 = vmatpush3.bf16.msra.mxu0 %v572_v3  ;;  %540 = vmatprep.subr.bf16.mxu1 %v584_v11 }
  0x6b   :  { %518 = vmatprep.subr.bf16.mxu0 %v573_v5 }
  0x6d   :  { %541 = vmatpush3.bf16.msra.mxu1 %v584_v11 }
  0x6e   :  { %519 = vmatpush3.bf16.msra.mxu0 %v573_v5  ;;  %542 = vmatprep.subr.bf16.mxu1 %v585_v13 }
  0x6f   :  { %520 = vmatprep.subr.bf16.mxu0 %v574_v8 }
  0x71   :  { %543 = vmatpush3.bf16.msra.mxu1 %v585_v13 }
  0x72   :  { %521 = vmatpush3.bf16.msra.mxu0 %v574_v8  ;;  %544 = vmatprep.subr.bf16.mxu1 %v586_v14 }
  0x73   :  { %522 = vmatprep.subr.bf16.mxu0 %v575_v10 }
  0x75   :  { %545 = vmatpush3.bf16.msra.mxu1 %v586_v14 }
  0x76   :  { %523 = vmatpush3.bf16.msra.mxu0 %v575_v10  ;;  %546 = vmatprep.subr.bf16.mxu1 %v587_v18 }
  0x77   :  { %524 = vmatprep.subr.bf16.mxu0 %v576_v12 }
  0x79   :  { %547 = vmatpush3.bf16.msra.mxu1 %v587_v18 }
  0x7a   :  { %525 = vmatpush3.bf16.msra.mxu0 %v576_v12  ;;  %548 = vmatprep.subr.bf16.mxu1 %v588_v19 }
  0x7d   :  { %527 = vmatmul.mubr.bf16.vlgmr.msra.gmra.mrb[0].mxu0 %v578_v15  ;;  %549 = vmatpush3.bf16.msra.mxu1 %v588_v19 }
  0x7e   :  { %530 = vmatprep.mubr.bf16.mxu0 %v579_v16 }
  0x85   :  { %531 = vmatmul.mubr.bf16.gmra.mrb[4].mxu0 %v580_v17 }
 0x150   :  { %v528_v21 = vpop.f32.mrb[0].mxu0 }
 0x151   :  { %v235_v22 = vadd.f32 %v528_v21, %v464_v20  ;;  %v226_v23 = vpop.f32.mrb[1].mxu0 }
 0x152   :  { %v227_v24 = vadd.f32 %v464_v20, %v226_v23  ;;  %v529_v25 = vpop.f32.mrb[2].mxu0 }
 0x153   :  { %v238_v26 = vadd.f32 %v529_v25, %v464_v20  ;;  %v229_v27 = vpop.f32.mrb[3].mxu0  ;;  %v259_v29 = vmax.f32 %v235_v22, 0.0 }
 0x154   :  { %v230_v28 = vadd.f32 %v464_v20, %v229_v27  ;;  %v257_v31 = vmax.f32 %v227_v24, 0.0 }
 0x155   :  { %v260_v30 = vmax.f32 %v238_v26, 0.0 }
 0x156   :  { %v258_v32 = vmax.f32 %v230_v28, 0.0 }
 0x157   :  { %v266_v33 = vpack.c.bf16 %v260_v30, %v259_v29 }
 0x158   :  { %v532_v34 = vpop.f32.mrb[4].mxu0  ;;  %v265_v35 = vpack.c.bf16 %v258_v32, %v257_v31 }
 0x159   :  { %v251_v36 = vadd.f32 %v532_v34, %v464_v20  ;;  %v242_v37 = vpop.f32.mrb[5].mxu0 }
 0x15a   :  { %v243_v38 = vadd.f32 %v464_v20, %v242_v37  ;;  %v533_v39 = vpop.f32.mrb[6].mxu0  ;;  %550 = vmatprep.mubr.bf16.mxu1 %v265_v35 }
 0x15b   :  { %v254_v40 = vadd.f32 %v533_v39, %v464_v20  ;;  %v245_v41 = vpop.f32.mrb[7].mxu0  ;;  %551 = vmatmul.mubr.bf16.vlgmr.msra.gmra.mrb[0].mxu1 %v266_v33  ;;  %v263_v43 = vmax.f32 %v251_v36, 0.0 }
 0x15c   :  { %v246_v42 = vadd.f32 %v464_v20, %v245_v41  ;;  %v261_v45 = vmax.f32 %v243_v38, 0.0 }
 0x15d   :  { %v264_v44 = vmax.f32 %v254_v40, 0.0 }
 0x15e   :  { %v262_v46 = vmax.f32 %v246_v42, 0.0 }
 0x15f   :  { %v268_v47 = vpack.c.bf16 %v264_v44, %v263_v43 }
 0x160   :  { %v267_v48 = vpack.c.bf16 %v262_v46, %v261_v45 }
 0x162   :  { %554 = vmatprep.mubr.bf16.mxu1 %v267_v48 }
 0x163   :  { %555 = vmatmul.mubr.bf16.gmra.mrb[4].mxu1 %v268_v47 }
 0x22e   :  { %v552_v50 = vpop.f32.mrb[0].mxu1 }
 0x22f   :  { %v383_v51 = vadd.f32 %v552_v50, %v477_v49  ;;  %v374_v52 = vpop.f32.mrb[1].mxu1 }
 0x230   :  { %v375_v53 = vadd.f32 %v477_v49, %v374_v52  ;;  %v553_v54 = vpop.f32.mrb[2].mxu1 }
 0x231   :  { %v407_v55 = vmax.f32 %v383_v51, 0.0  ;;  %v386_v56 = vadd.f32 %v553_v54, %v477_v49  ;;  %v377_v57 = vpop.f32.mrb[3].mxu1 }
 0x232   :  { %v405_v58 = vmax.f32 %v375_v53, 0.0  ;;  %v378_v59 = vadd.f32 %v477_v49, %v377_v57 }
 0x233   :  { %415 = vst [vmem:[#allocation11 + $0x10] sm:$0xff] %v407_v55  ;;  %v408_v60 = vmax.f32 %v386_v56, 0.0 }
 0x234   :  { %413 = vst [vmem:[#allocation11] sm:$0xff] %v405_v58  ;;  %v421_v61 = vmax.f32 %v405_v58, %v407_v55  ;;  %v406_v62 = vmax.f32 %v378_v59, 0.0 }
 0x235   :  { %416 = vst [vmem:[#allocation11 + $0x18] sm:$0xff] %v408_v60 }
 0x236   :  { %414 = vst [vmem:[#allocation11 + $0x8] sm:$0xff] %v406_v62  ;;  %v422_v63 = vmax.f32 %v406_v62, %v408_v60  ;;  %v556_v0 = vpop.f32.mrb[4].mxu1 }
 0x237   :  { %v399_v1 = vadd.f32 %v556_v0, %v477_v49  ;;  %v390_v2 = vpop.f32.mrb[5].mxu1 }
 0x238   :  { %v391_v3 = vadd.f32 %v477_v49, %v390_v2  ;;  %v557_v4 = vpop.f32.mrb[6].mxu1 }
 0x239   :  { %v411_v5 = vmax.f32 %v399_v1, 0.0  ;;  %v402_v6 = vadd.f32 %v557_v4, %v477_v49  ;;  %v393_v7 = vpop.f32.mrb[7].mxu1 }
 0x23a   :  { %v409_v8 = vmax.f32 %v391_v3, 0.0  ;;  %v394_v9 = vadd.f32 %v477_v49, %v393_v7 }
 0x23b   :  { %419 = vst [vmem:[#allocation11 + $0x30] sm:$0xff] %v411_v5  ;;  %v412_v10 = vmax.f32 %v402_v6, 0.0 }
 0x23c   :  { %417 = vst [vmem:[#allocation11 + $0x20] sm:$0xff] %v409_v8  ;;  %v423_v11 = vmax.f32 %v421_v61, %v409_v8  ;;  %v410_v12 = vmax.f32 %v394_v9, 0.0 }
 0x23d   :  { %420 = vst [vmem:[#allocation11 + $0x38] sm:$0xff] %v412_v10 }
 0x23e   :  { %v425_v13 = vmax.f32 %v423_v11, %v411_v5  ;;  %418 = vst [vmem:[#allocation11 + $0x28] sm:$0xff] %v410_v12  ;;  %v424_v14 = vmax.f32 %v422_v63, %v410_v12 }
 0x23f   :  { %710 = shalt.err (!%p707_p2)
}
 0x240   :  { %s711_s15 = scalar_lea.hbm %s904_s5, 1024 }
 0x241   :  { %p712_p3 = scmp.ne.s32.totalorder %s904_s5, %s711_s15  ;;  %p715_p4 = scmp.lt.u32.totalorder %s711_s15, %s904_s5 }
 0x243   :  { %p717_p5 = pnand %p715_p4, %p712_p3 }
 0x245   :  { %720 = shalt.err (!%p717_p5)
}
 0x246   :  { %s762_s20 = smov 128   ;;  %s763_s1 = smov 8   ;;  %427 = vst [vmem:[#allocation12] sm:$0xff] %v425_v13  ;;  %v426_v15 = vmax.f32 %v424_v14, %v412_v10 }
 0x247   :  { %440 = dma.vmem_to_hbm [thread:$0]  %s435_s11, 1024, %s904_s5, [#allocation4], %s762_s20, %s762_s20, %s763_s1  }
 0x248   :  { %428 = vst [vmem:[#allocation12 + $0x8] sm:$0xff] %v426_v15  ;;  %s721_s10 = scalar_lea.vmem %s447_s24, 256  ;;  %p726_p7 = scmp.lt.s32.totalorder %s447_s24, %s447_s24 }
 0x249   :  { %p722_p6 = scmp.ne.s32.totalorder %s447_s24, %s721_s10  ;;  %p727_p8 = scmp.lt.s32.totalorder %s721_s10, %s721_s10 }
 0x24b   :  { %p728_p9 = por %p727_p8, %p726_p7 }
 0x24d   :  { %p729_p10 = pnand %p728_p9, %p722_p6 }
 0x24f   :  { %732 = shalt.err (!%p729_p10)
}
 0x250   :  { %s733_s23 = scalar_lea.hbm %s905_s6, 256 }
 0x251   :  { %p734_p11 = scmp.ne.s32.totalorder %s905_s6, %s733_s23  ;;  %p737_p12 = scmp.lt.u32.totalorder %s733_s23, %s905_s6 }
 0x253   :  { %p739_p13 = pnand %p737_p12, %p734_p11 }
 0x255   :  { %742 = shalt.err (!%p739_p13)
}
 0x256   :  { %452 = dma.vmem_to_hbm [thread:$0]  %s447_s24, 256, %s905_s6, [#allocation13], %s762_s20, %s762_s20, %s763_s1  }
 0x257   :  { %749 = dma.done.wait [#allocation4], 1024  }
 0x258   :  { %750 = vsyncadd [#allocation4], 4294966272 }
 0x259   :  { %751 = dma.done.wait [#allocation13], 256  }
 0x25a   :  { %752 = vsyncadd [#allocation13], 4294967040 }
 0x25b   :  { %459 = vsyncpa [#allocation3], 1 }
 0x25c   :  { %460 = vsyncpa [#allocation6], 1 }
 0x25d   :  { %461 = vsyncpa [#allocation9], 1 }
 0x25e   :  { %462 = vsyncpa [#allocation4], 1 }
 0x25f   :  { %463 = vsyncpa [#allocation13], 1 }

</bundles_post_ra>
